<compile_context>
chip_gen: v5e
topology: v5e:2x2
jax: 0.10.0
libtpu: 0.0.40
codegen_flags: <defaults>
</compile_context>

<pallas_src>
import jax
import jax.numpy as jnp
from jax import lax
from jax.experimental import pallas as pl
from jax.experimental.pallas import tpu as pltpu

EPS = 1e-5


def addnorm_kernel(x_ref, y_ref, gamma_ref, beta_ref, o_ref):
    # Residual add (dropout is identity in eval mode).
    # TODO(synk): training-mode dropout would use pltpu.prng_seed +
    # pltpu.prng_random_bits to build a Bernoulli keep-mask; omitted (eval mode).
    z = y_ref[...].astype(jnp.float32) + x_ref[...].astype(jnp.float32)

    # One-pass statistics: issue both lane-axis reductions back-to-back so the
    # XLU pipeline overlaps them (sum and sum-of-squares in a single sweep).
    h = z.shape[-1]
    inv_h = 1.0 / h
    s1 = jnp.sum(z, axis=-1, keepdims=True)
    s2 = jnp.sum(z * z, axis=-1, keepdims=True)
    mean = s1 * inv_h
    var = jnp.maximum(s2 * inv_h - mean * mean, 0.0)  # clamp guards cancellation
    inv = lax.rsqrt(var + EPS)                        # EUP op (free slot)

    gamma = gamma_ref[...].astype(jnp.float32)  # (1, H) -> broadcast over rows
    beta = beta_ref[...].astype(jnp.float32)
    o_ref[...] = ((z - mean) * inv * gamma + beta).astype(o_ref.dtype)


def _round_up(a, b):
    return ((a + b - 1) // b) * b


def add_norm(x, y, gamma, beta, *, tile_rows=None,
             vmem_budget_bytes=28 * 1024 * 1024):
    """x, y: (B, S, H); gamma, beta: (H,). Returns (B, S, H). Eval-mode dropout."""
    B, S, H = x.shape
    rows = B * S
    x2 = x.reshape(rows, H)
    y2 = y.reshape(rows, H)
    g2 = gamma.reshape(1, H)
    b2 = beta.reshape(1, H)

    itemsize = jnp.dtype(x.dtype).itemsize
    # Sublane packing: 8 rows/vreg for 4-byte dtypes, 16 for bf16, 32 for int8.
    sublane = max(8, 32 // max(itemsize, 1))

    if tile_rows is None:
        # 3 row-tiled arrays (x, y, out), each double-buffered by the pipeline.
        bytes_per_row = 3 * 2 * H * itemsize
        tr = vmem_budget_bytes // max(bytes_per_row, 1)
        tr = max(sublane, min(int(tr), 1024))
    else:
        tr = max(sublane, int(tile_rows))
    # Never tile wider than the (sublane-rounded) problem; keep sublane-aligned.
    tr = min(tr, _round_up(rows, sublane))
    tr = _round_up(tr, sublane)

    # cdiv grid: no whole-tensor fallback; boundary block is masked by Pallas.
    grid = (pl.cdiv(rows, tr),)

    # Scoped-VMEM request: actual double-buffered tile footprint + headroom,
    # capped at 48 MiB so it also fits v7x's 64 MiB physical VMEM.
    tile_bytes = 3 * 2 * tr * H * itemsize + 2 * H * 4
    vmem_limit = int(min(max(tile_bytes + (8 << 20), 32 << 20), 48 << 20))

    # Advisory cost hint: this call is HBM-bandwidth bound.
    cost = pl.CostEstimate(
        flops=8 * rows * H,
        transcendentals=rows,                       # one rsqrt per row
        bytes_accessed=3 * rows * H * itemsize + 2 * H * 4,
    )

    out2 = pl.pallas_call(
        addnorm_kernel,
        out_shape=jax.ShapeDtypeStruct((rows, H), x.dtype),
        grid_spec=pltpu.PrefetchScalarGridSpec(
            num_scalar_prefetch=0,
            grid=grid,
            in_specs=[
                pl.BlockSpec((tr, H), lambda i: (i, 0)),   # X rows
                pl.BlockSpec((tr, H), lambda i: (i, 0)),   # Y rows
                pl.BlockSpec((1, H), lambda i: (0, 0)),    # gamma (stays resident)
                pl.BlockSpec((1, H), lambda i: (0, 0)),    # beta  (stays resident)
            ],
            out_specs=pl.BlockSpec((tr, H), lambda i: (i, 0)),
        ),
        compiler_params=pltpu.CompilerParams(
            dimension_semantics=("parallel",),   # shards grid across TCs on v7x
            vmem_limit_bytes=vmem_limit,
        ),
        cost_estimate=cost,
    )(x2, y2, g2, b2)

    return out2.reshape(B, S, H)


def add_norm_ref(x, y, gamma, beta):
    z = (y + x).astype(jnp.float32)
    mean = jnp.mean(z, axis=-1, keepdims=True)
    var = jnp.mean((z - mean) ** 2, axis=-1, keepdims=True)
    normed = (z - mean) * lax.rsqrt(var + EPS)
    return (normed * gamma + beta).astype(x.dtype)


if __name__ == "__main__":
    B, S, H = 2, 8, 32  # batch, seq, hidden; normalized_shape = H

    key = jax.random.PRNGKey(0)
    kx, ky = jax.random.split(key)
    x = jax.random.normal(kx, (B, S, H), dtype=jnp.float32)
    y = jax.random.normal(ky, (B, S, H), dtype=jnp.float32)

    # Deterministic LayerNorm affine parameters (nontrivial, not a checkpoint).
    gamma = 1.0 + 0.01 * jnp.arange(H, dtype=jnp.float32)
    beta = 0.05 * jnp.arange(H, dtype=jnp.float32) - 0.5

    out = add_norm(x, y, gamma, beta)
    out = jax.block_until_ready(out)

    ref = add_norm_ref(x, y, gamma, beta)
    assert out.shape == (B, S, H)
    assert jnp.allclose(out, ref, atol=2e-5, rtol=1e-5), "mismatch vs reference"

    print("KERNEL_OK")
</pallas_src>

<mosaic_0001>
module attributes {stable_mosaic.version = 11 : i64} {
  func.func @addnorm_kernel(%arg0: i32, %arg1: memref<16x32xf32, #tpu.memory_space<vmem>>, %arg2: memref<16x32xf32, #tpu.memory_space<vmem>>, %arg3: memref<1x32xf32, #tpu.memory_space<vmem>>, %arg4: memref<1x32xf32, #tpu.memory_space<vmem>>, %arg5: memref<16x32xf32, #tpu.memory_space<vmem>>) attributes {dimension_semantics = [#tpu.dimension_semantics<parallel>], iteration_bounds = array<i64: 1>, scalar_prefetch = 0 : i64, scratch_operands = 0 : i64, tpu.core_type = #tpu.core_type<tc>, window_params = [{transform_indices = @transform_0, window_bounds = array<i64: 16, 32>}, {transform_indices = @transform_1, window_bounds = array<i64: 16, 32>}, {pipeline_mode = #tpu.pipeline_mode<synchronous>, transform_indices = @transform_2, window_bounds = array<i64: 1, 32>}, {pipeline_mode = #tpu.pipeline_mode<synchronous>, transform_indices = @transform_3, window_bounds = array<i64: 1, 32>}, {transform_indices = @transform_4, window_bounds = array<i64: 16, 32>}]} {
    %c0 = arith.constant 0 : index
    %c0_0 = arith.constant 0 : index
    %0 = vector.load %arg2[%c0, %c0_0] : memref<16x32xf32, #tpu.memory_space<vmem>>, vector<16x32xf32>
    %c0_1 = arith.constant 0 : index
    %c0_2 = arith.constant 0 : index
    %1 = vector.load %arg1[%c0_1, %c0_2] : memref<16x32xf32, #tpu.memory_space<vmem>>, vector<16x32xf32>
    %2 = arith.addf %0, %1 : vector<16x32xf32>
    %cst = arith.constant dense<0.000000e+00> : vector<16xf32>
    %3 = vector.multi_reduction <add>, %2, %cst [1] : vector<16x32xf32> to vector<16xf32>
    %4 = vector.shape_cast %3 : vector<16xf32> to vector<16x1xf32>
    %5 = arith.mulf %2, %2 : vector<16x32xf32>
    %cst_3 = arith.constant dense<0.000000e+00> : vector<16xf32>
    %6 = vector.multi_reduction <add>, %5, %cst_3 [1] : vector<16x32xf32> to vector<16xf32>
    %7 = vector.shape_cast %6 : vector<16xf32> to vector<16x1xf32>
    %cst_4 = arith.constant 3.125000e-02 : f32
    %8 = vector.broadcast %cst_4 : f32 to vector<16x1xf32>
    %9 = arith.mulf %4, %8 : vector<16x1xf32>
    %cst_5 = arith.constant 3.125000e-02 : f32
    %10 = vector.broadcast %cst_5 : f32 to vector<16x1xf32>
    %11 = arith.mulf %7, %10 : vector<16x1xf32>
    %12 = arith.mulf %9, %9 : vector<16x1xf32>
    %13 = arith.subf %11, %12 : vector<16x1xf32>
    %cst_6 = arith.constant 0.000000e+00 : f32
    %14 = vector.broadcast %cst_6 : f32 to vector<16x1xf32>
    %15 = arith.maximumf %13, %14 : vector<16x1xf32>
    %cst_7 = arith.constant 9.99999974E-6 : f32
    %16 = vector.broadcast %cst_7 : f32 to vector<16x1xf32>
    %17 = arith.addf %15, %16 : vector<16x1xf32>
    %18 = math.rsqrt %17 : vector<16x1xf32>
    %c0_8 = arith.constant 0 : index
    %c0_9 = arith.constant 0 : index
    %19 = vector.load %arg3[%c0_8, %c0_9] : memref<1x32xf32, #tpu.memory_space<vmem>>, vector<1x32xf32>
    %c0_10 = arith.constant 0 : index
    %c0_11 = arith.constant 0 : index
    %20 = vector.load %arg4[%c0_10, %c0_11] : memref<1x32xf32, #tpu.memory_space<vmem>>, vector<1x32xf32>
    %21 = vector.broadcast %9 : vector<16x1xf32> to vector<16x32xf32>
    %22 = arith.subf %2, %21 : vector<16x32xf32>
    %23 = vector.broadcast %18 : vector<16x1xf32> to vector<16x32xf32>
    %24 = arith.mulf %22, %23 : vector<16x32xf32>
    %25 = vector.broadcast %19 : vector<1x32xf32> to vector<16x32xf32>
    %26 = arith.mulf %24, %25 : vector<16x32xf32>
    %27 = vector.broadcast %20 : vector<1x32xf32> to vector<16x32xf32>
    %28 = arith.addf %26, %27 : vector<16x32xf32>
    %c0_12 = arith.constant 0 : index
    %c0_13 = arith.constant 0 : index
    %29 = vector.load %arg5[%c0_12, %c0_13] : memref<16x32xf32, #tpu.memory_space<vmem>>, vector<16x32xf32>
    tpu.vector_store %arg5[%c0_12, %c0_13], %28 {strides = array<i32>} : memref<16x32xf32, #tpu.memory_space<vmem>>, vector<16x32xf32>,
    return
  }
  func.func @transform_0(%arg0: i32) -> (i32, i32) {
    %c0_i32 = arith.constant 0 : i32
    %c0_i32_0 = arith.constant 0 : i32
    return %arg0, %c0_i32 : i32, i32
  }
  func.func @transform_1(%arg0: i32) -> (i32, i32) {
    %c0_i32 = arith.constant 0 : i32
    %c0_i32_0 = arith.constant 0 : i32
    return %arg0, %c0_i32 : i32, i32
  }
  func.func @transform_2(%arg0: i32) -> (i32, i32) {
    %c0_i32 = arith.constant 0 : i32
    %c0_i32_0 = arith.constant 0 : i32
    %c0_i32_1 = arith.constant 0 : i32
    return %c0_i32, %c0_i32_0 : i32, i32
  }
  func.func @transform_3(%arg0: i32) -> (i32, i32) {
    %c0_i32 = arith.constant 0 : i32
    %c0_i32_0 = arith.constant 0 : i32
    %c0_i32_1 = arith.constant 0 : i32
    return %c0_i32, %c0_i32_0 : i32, i32
  }
  func.func @transform_4(%arg0: i32) -> (i32, i32) {
    %c0_i32 = arith.constant 0 : i32
    %c0_i32_0 = arith.constant 0 : i32
    return %arg0, %c0_i32 : i32, i32
  }
}

</mosaic_0001>

<bundles_post_ra>
// kernel: tpu_custom_call.1
= control target key start
LH: loop header
LB: loop body
LE: loop exit
PB: predicated region body
PF: predicated region fallthrough
CT: control target
= control target key end

     0   :  { %9 = vsyncpa [#allocation3], 0  ;;  %s290_s0 = inlined_call_operand.hbm [shape: f32[16,32], index: 0, kind: input, shape index: {}]   ;;  %s291_s1 = inlined_call_operand.hbm [shape: f32[16,32], index: 1, kind: input, shape index: {}]   ;;  %s292_s2 = inlined_call_operand.vmem [shape: f32[1,32], index: 2, kind: input, shape index: {}]   ;;  %s293_s3 = inlined_call_operand.vmem [shape: f32[1,32], index: 3, kind: input, shape index: {}]   ;;  %s294_s4 = inlined_call_operand.hbm [shape: f32[16,32], index: 4, kind: output, shape index: {}]  }
   0x1   :  { %10 = vsyncpa [#allocation6], 0 }
   0x2   :  { %11 = vsyncpa [#allocation4], 0  ;;  %s16_s17 = sshll.u32 %s290_s0, 4  ;;  %s230_s18 = smov [#allocation2]   ;;  %s17_s17 = int_to_ptr.hbm [resolvable:$true] %s16_s17 }
   0x3   :  { %s18_s19 = sshll.u32 %s230_s18, 4  ;;  %s29_s22 = sshll.u32 %s291_s1, 4  ;;  %s19_s19 = int_to_ptr.vmem [resolvable:$true] %s18_s19  ;;  %s30_s22 = int_to_ptr.hbm [resolvable:$true] %s29_s22 }
   0x4   :  { %s231_s23 = smov 128   ;;  %s232_s24 = smov 8  }
   0x5   :  { %24 = dma.hbm_to_vmem [thread:$0]  %s17_s17, 256, %s19_s19, [#allocation3], %s231_s23, %s231_s23, %s232_s24  }
   0x6   :  { %s233_s25 = smov [#allocation5]  }
   0x7   :  { %s31_s26 = sshll.u32 %s233_s25, 4  ;;  %s32_s26 = int_to_ptr.vmem [resolvable:$true] %s31_s26 }
   0x8   :  { %37 = dma.hbm_to_vmem [thread:$0]  %s30_s22, 256, %s32_s26, [#allocation6], %s231_s23, %s231_s23, %s232_s24  }
   0x9   :  { %224 = dma.done.wait [#allocation3], 256  }
   0xa   :  { %225 = vsyncadd [#allocation3], 4294967040 }
   0xb   :  { %226 = dma.done.wait [#allocation6], 256  }
   0xc   :  { %227 = vsyncadd [#allocation6], 4294967040  ;;  %v50_v0 = vld [vmem:[#allocation5] sm:$0xff]  ;;  %v52_v1 = vld [vmem:[#allocation2] sm:$0xff]  ;;  %vm56_vm0 = vcmask 261120   ;;  %s127_s6 = sshll.u32 %s294_s4, 4  ;;  %s128_s6 = int_to_ptr.hbm [resolvable:$true] %s127_s6 }
   0xd   :  { %v51_v2 = vld [vmem:[#allocation5 + $0x8] sm:$0xff]  ;;  %v54_v3 = vadd.f32 %v52_v1, %v50_v0  ;;  %v53_v4 = vld [vmem:[#allocation2 + $0x8] sm:$0xff]  ;;  %v146_v37 = vld [vmem:[%s292_s2] ss:$0 sm:$0xff]  ;;  %s234_s2 = smov [#allocation7]  }
   0xe   :  { %v55_v7 = vadd.f32 %v53_v4, %v51_v2  ;;  %v147_v41 = vld [vmem:[%s293_s3] ss:$0 sm:$0xff]  ;;  %s125_s29 = sshll.u32 %s234_s2, 4  ;;  %s126_s29 = int_to_ptr.vmem [resolvable:$true] %s125_s29 }
   0xf   :  { %v57_v5 = vsel %vm56_vm0, %v54_v3, 0.0  ;;  %v63_v6 = vmul.f32 %v54_v3, %v54_v3 }
  0x10   :  { %58 = vadd.xlane.f32.xlu0 %v57_v5  ;;  %v64_v9 = vmul.f32 %v55_v7, %v55_v7  ;;  %v60_v10 = vsel %vm56_vm0, %v55_v7, 0.0 }
  0x11   :  { %v65_v8 = vsel %vm56_vm0, %v63_v6, 0.0 }
  0x12   :  { %66 = vadd.xlane.f32.xlu1 %v65_v8  ;;  %v68_v11 = vsel %vm56_vm0, %v64_v9, 0.0 }
  0x18   :  { %61 = vadd.xlane.f32.xlu0 %v60_v10 }
  0x1a   :  { %69 = vadd.xlane.f32.xlu1 %v68_v11 }
  0x83   :  { %v59_v12 = vpop.xlane.xlu0 %58 }
  0x84   :  { %v71_v13 = vmul.f32 0.03125, %v59_v12 }
  0x85   :  { %v67_v14 = vpop.xlane.xlu1 %66 }
  0x86   :  { %v75_v15 = vmul.f32 %v71_v13, %v71_v13  ;;  %v73_v16 = vmul.f32 0.03125, %v67_v14  ;;  %v105_v35 = vsub.f32 %v54_v3, %v71_v13 }
  0x88   :  { %v77_v17 = vsub.f32 %v73_v16, %v75_v15 }
  0x8a   :  { %v79_v18 = vmax.f32 %v77_v17, 0.0 }
  0x8b   :  { %v62_v19 = vpop.xlane.xlu0 %61 }
  0x8c   :  { %v81_v20 = vadd.f32 1e-05, %v79_v18  ;;  %v72_v21 = vmul.f32 0.03125, %v62_v19 }
  0x8d   :  { %v70_v22 = vpop.xlane.xlu1 %69 }
  0x8e   :  { %148 = vrsqrt.f32 %v81_v20  ;;  %v76_v23 = vmul.f32 %v72_v21, %v72_v21  ;;  %v74_v24 = vmul.f32 0.03125, %v70_v22  ;;  %vm89_vm2 = vweird.f32 %v81_v20 }
  0x8f   :  { %v106_v47 = vsub.f32 %v55_v7, %v72_v21 }
  0x90   :  { %v78_v25 = vsub.f32 %v74_v24, %v76_v23 }
  0x92   :  { %v80_v26 = vmax.f32 %v78_v25, 0.0 }
  0x94   :  { %v149_v27 = vpop.eup %148  ;;  %v82_v29 = vadd.f32 1e-05, %v80_v26 }
  0x95   :  { %v84_v28 = vmul.f32 %v149_v27, %v81_v20  ;;  %vm90_vm1 = vweird.f32 %v149_v27 }
  0x96   :  { %150 = vrsqrt.f32 %v82_v29  ;;  %vm91_vm3 = vmor %vm89_vm2, %vm90_vm1  ;;  %vm99_vm5 = vweird.f32 %v82_v29 }
  0x97   :  { %v85_v30 = vmul.f32 %v149_v27, %v84_v28 }
  0x99   :  { %v86_v31 = vmul.f32 0.5, %v85_v30 }
  0x9b   :  { %v87_v32 = vsub.f32 1.5, %v86_v31 }
  0x9c   :  { %v151_v33 = vpop.eup %150 }
  0x9d   :  { %v88_v34 = vmul.f32 %v149_v27, %v87_v32  ;;  %v94_v36 = vmul.f32 %v151_v33, %v82_v29  ;;  %vm100_vm4 = vweird.f32 %v151_v33 }
  0x9e   :  { %vm101_vm6 = vmor %vm99_vm5, %vm100_vm4 }
  0x9f   :  { %v92_v38 = vsel %vm91_vm3, %v149_v27, %v88_v34  ;;  %v95_v40 = vmul.f32 %v151_v33, %v94_v36 }
  0xa0   :  { %v107_v39 = vmul.f32 %v105_v35, %v92_v38 }
  0xa1   :  { %v96_v42 = vmul.f32 0.5, %v95_v40 }
  0xa2   :  { %v112_v43 = vmul.f32 %v146_v37, %v107_v39 }
  0xa3   :  { %v97_v44 = vsub.f32 1.5, %v96_v42 }
  0xa4   :  { %v117_v45 = vadd.f32 %v147_v41, %v112_v43 }
  0xa5   :  { %v98_v46 = vmul.f32 %v151_v33, %v97_v44 }
  0xa6   :  { %119 = vst.msk [vmem:[#allocation7] sm:$0xff] %vm56_vm0, %v117_v45 }
  0xa7   :  { %v102_v48 = vsel %vm101_vm6, %v151_v33, %v98_v46 }
  0xa8   :  { %v108_v49 = vmul.f32 %v106_v47, %v102_v48 }
  0xaa   :  { %v113_v50 = vmul.f32 %v146_v37, %v108_v49 }
  0xac   :  { %v118_v51 = vadd.f32 %v147_v41, %v113_v50 }
  0xae   :  { %120 = vst.msk [vmem:[#allocation7 + $0x8] sm:$0xff] %vm56_vm0, %v118_v51 }
  0xaf   :  { %133 = dma.vmem_to_hbm [thread:$0]  %s126_s29, 256, %s128_s6, [#allocation4], %s231_s23, %s231_s23, %s232_s24  }
  0xb0   :  { %228 = dma.done.wait [#allocation4], 256  }
  0xb1   :  { %229 = vsyncadd [#allocation4], 4294967040 }
  0xb2   :  { %138 = vsyncpa [#allocation3], 1 }
  0xb3   :  { %139 = vsyncpa [#allocation6], 1 }
  0xb4   :  { %140 = vsyncpa [#allocation4], 1 }

</bundles_post_ra>
